<compile_context>
chip_gen: v5e
topology: v5e:2x2
jax: 0.10.0
libtpu: 0.0.40
codegen_flags: <defaults>
</compile_context>

<pallas_src>
import math

import jax
import jax.numpy as jnp
from jax.experimental import pallas as pl
from jax.experimental.pallas import tpu as pltpu

_WEIGHTS = [0.32, 0.08, 0.02, 0.01, 0.005, 0.00125, 0.0003125]

_LANE = 128
_SUB = 8
_GROUP = _SUB * _LANE            # flattened-spatial axis padded to a multiple of this
_TILE_BYTES = 6 * 1024 * 1024    # HBM bytes streamed per grid step (all operands together)
_VMEM_LIMIT = 32 * 1024 * 1024   # scoped-VMEM request (<= physical on v5e/v6e/v7x)
_MIN_PALLAS_PIXELS = 16384       # below this, reduce the level in plain jnp (XLA fuses)
_NEG_LOGIT_PAD = -1e4            # softplus() == 0 and (x > 0) == False exactly in f32


# ------------------------------- tiling helpers ------------------------------- #

def _round_up(x, m):
    return (x + m - 1) // m * m


def _choose_group_tile(n_groups, bytes_per_group, tile_bytes):
    """Largest multiple of 8 that divides n_groups and fits the byte budget (>= 8)."""
    budget = (tile_bytes // max(1, bytes_per_group)) // _SUB * _SUB
    gt = max(_SUB, min(n_groups, budget))
    while gt > _SUB and n_groups % gt != 0:
        gt -= _SUB
    return gt


def _prep_lane_major(arr, rows, channels, cols, cols_p, pad_value):
    """Reshape to (rows[, channels], n_groups, 128): the sublane dim is the lane-group
    index (multiple of 8 after padding), so VMEM blocks carry no sublane padding."""
    if channels is None:
        a = arr.reshape(rows, cols)
        if cols_p != cols:
            a = jnp.pad(a, ((0, 0), (0, cols_p - cols)), constant_values=pad_value)
        return a.reshape(rows, cols_p // _LANE, _LANE)
    a = arr.reshape(rows, channels, cols)
    if cols_p != cols:
        a = jnp.pad(a, ((0, 0), (0, 0), (0, cols_p - cols)), constant_values=pad_value)
    return a.reshape(rows, channels, cols_p // _LANE, _LANE)


# ------------------------------- Pallas kernels ------------------------------- #

def _make_level_kernel(n_flow, n_occ, flow_scale):
    """Fused per-level reduction: one flow target + n_flow flow predictions and one occ
    target + n_occ occlusion logit maps.  Each prediction accumulates an (8, 128)
    partial-sum slab directly into its own output block."""
    n_in = (1 + n_flow if n_flow else 0) + (1 + n_occ if n_occ else 0)

    def kernel(*refs):
        in_refs = refs[:n_in]
        out_refs = refs[n_in:]
        k = pl.program_id(1)

        @pl.when(k == 0)
        def _init():
            for o_ref in out_refs:
                o_ref[...] = jnp.zeros_like(o_ref)

        idx = 0
        oidx = 0
        if n_flow:
            # target is loaded and scaled once, shared by every flow prediction
            ft = in_refs[idx][...].astype(jnp.float32) * flow_scale   # (rf, 2, gt, 128)
            idx += 1
            for _ in range(n_flow):
                d = ft - in_refs[idx][...].astype(jnp.float32)
                idx += 1
                epe = jnp.sqrt(jnp.sum(d * d, axis=1))                # (rf, gt, 128)
                # vreg-aligned fold: pure VPU adds (no per-step XLU reduce tree)
                out_refs[oidx][...] += jnp.sum(
                    epe.reshape(-1, _SUB, _LANE), axis=0)             # (8, 128)
                oidx += 1
        if n_occ:
            ot = in_refs[idx][...].astype(jnp.float32)                # (ro, gt, 128)
            idx += 1
            for _ in range(n_occ):
                x = in_refs[idx][...].astype(jnp.float32)
                idx += 1
                # sum BCE(sigmoid(x), t) == sum softplus(x) - t*x   (stable form)
                sp = jnp.maximum(x, 0.0) + jnp.log(1.0 + jnp.exp(-jnp.abs(x)))
                out_refs[oidx][...] += jnp.sum(
                    (sp - ot * x).reshape(-1, _SUB, _LANE), axis=0)
                oidx += 1

    return kernel


def _f1_kernel(t_ref, x_ref, tp_ref, ps_ref, ts_ref):
    """F1 partials: per-(b*c)-row sums of p*t, p, t with p = (logit > 0)."""
    k = pl.program_id(1)

    @pl.when(k == 0)
    def _init():
        tp_ref[...] = jnp.zeros_like(tp_ref)
        ps_ref[...] = jnp.zeros_like(ps_ref)
        ts_ref[...] = jnp.zeros_like(ts_ref)

    t = t_ref[...].astype(jnp.float32)                        # (r, gt, 128)
    # round(sigmoid(x)) with round-half-to-even == (x > 0): plain VPU compare.
    p = (x_ref[...] > 0).astype(jnp.float32)
    r, gt, _ = t.shape

    def fold(v):                                              # -> (1, r, 8, 128)
        return jnp.sum(v.reshape(r, gt // _SUB, _SUB, _LANE), axis=1)[None]

    tp_ref[...] += fold(p * t)
    ps_ref[...] += fold(p)
    ts_ref[...] += fold(t)


# ------------------------------- pallas wrappers ------------------------------- #

def _fused_level_sums_pallas(flow_target, flow_preds, occ_target, occ_preds,
                             flow_scale, tile_bytes=_TILE_BYTES):
    """One pallas_call per pyramid level: every prediction sharing this resolution is
    reduced while its target level is streamed from HBM exactly once.
    Returns ([epe_sum per flow pred], [bce_sum per occ pred]) as f32 scalars."""
    n_flow = len(flow_preds)
    n_occ = len(occ_preds)
    assert n_flow + n_occ > 0
    ref_arr = flow_preds[0] if n_flow else occ_preds[0]
    h, w = int(ref_arr.shape[-2]), int(ref_arr.shape[-1])
    cols = h * w
    cols_p = _round_up(cols, _GROUP)
    n_groups = cols_p // _LANE

    inputs = []
    bytes_per_group = 0
    rf = ro = 0
    if n_flow:
        assert flow_preds[0].shape[-3] == 2
        rf = math.prod(flow_preds[0].shape[:-3])
        inputs.append(_prep_lane_major(flow_target, rf, 2, cols, cols_p, 0.0))
        bytes_per_group += rf * 2 * _LANE * flow_target.dtype.itemsize
        for p in flow_preds:
            inputs.append(_prep_lane_major(p, rf, 2, cols, cols_p, 0.0))
            bytes_per_group += rf * 2 * _LANE * p.dtype.itemsize
    if n_occ:
        ro = math.prod(occ_preds[0].shape[:-2])
        inputs.append(_prep_lane_major(occ_target, ro, None, cols, cols_p, 0.0))
        bytes_per_group += ro * _LANE * occ_target.dtype.itemsize
        for p in occ_preds:
            inputs.append(_prep_lane_major(p, ro, None, cols, cols_p, _NEG_LOGIT_PAD))
            bytes_per_group += ro * _LANE * p.dtype.itemsize

    gt = _choose_group_tile(n_groups, bytes_per_group, tile_bytes)
    nblocks = n_groups // gt
    nsplit = 2 if nblocks % 2 == 0 else 1      # split the stream across both TCs on v7x
    kb = nblocks // nsplit

    in_specs = []
    if n_flow:
        fspec = pl.BlockSpec((rf, 2, gt, _LANE), lambda c, k: (0, 0, c * kb + k, 0))
        in_specs.extend([fspec] * (1 + n_flow))
    if n_occ:
        ospec = pl.BlockSpec((ro, gt, _LANE), lambda c, k: (0, c * kb + k, 0))
        in_specs.extend([ospec] * (1 + n_occ))

    n_out = n_flow + n_occ
    out_shape = tuple(jax.ShapeDtypeStruct((nsplit * _SUB, _LANE), jnp.float32)
                      for _ in range(n_out))
    out_specs = tuple(pl.BlockSpec((_SUB, _LANE), lambda c, k: (c, 0))
                      for _ in range(n_out))

    in_bytes = sum(int(x.size) * x.dtype.itemsize for x in inputs)
    flops = n_flow * rf * cols_p * 7 + n_occ * ro * cols_p * 6
    transcend = n_flow * rf * cols_p + 2 * n_occ * ro * cols_p

    outs = pl.pallas_call(
        _make_level_kernel(n_flow, n_occ, float(flow_scale)),
        out_shape=out_shape,
        grid_spec=pltpu.PrefetchScalarGridSpec(
            num_scalar_prefetch=0,
            grid=(nsplit, kb),
            in_specs=in_specs,
            out_specs=out_specs),
        compiler_params=pltpu.CompilerParams(
            dimension_semantics=("parallel", "arbitrary"),
            vmem_limit_bytes=_VMEM_LIMIT),
        cost_estimate=pl.CostEstimate(
            flops=int(flops), transcendentals=int(transcend),
            bytes_accessed=int(in_bytes + n_out * nsplit * _SUB * _LANE * 4)),
    )(*inputs)
    if not isinstance(outs, (tuple, list)):
        outs = (outs,)
    sums = [jnp.sum(o) for o in outs]
    return sums[:n_flow], sums[n_flow:]


def _f1_pallas(y_true, occ_logits, tile_bytes=_TILE_BYTES):
    """F1(y_true, round(sigmoid(logits))) for [B, C, H, W] inputs."""
    b, c, h, w = y_true.shape
    r = b * c
    cols = h * w
    cols_p = _round_up(cols, _GROUP)
    n_groups = cols_p // _LANE
    t = _prep_lane_major(y_true, r, None, cols, cols_p, 0.0)
    x = _prep_lane_major(occ_logits, r, None, cols, cols_p, _NEG_LOGIT_PAD)
    bytes_per_group = r * _LANE * (t.dtype.itemsize + x.dtype.itemsize)
    gt = _choose_group_tile(n_groups, bytes_per_group, tile_bytes)
    nblocks = n_groups // gt
    nsplit = 2 if nblocks % 2 == 0 else 1
    kb = nblocks // nsplit

    ispec = pl.BlockSpec((r, gt, _LANE), lambda ci, k: (0, ci * kb + k, 0))
    ospec = pl.BlockSpec((1, r, _SUB, _LANE), lambda ci, k: (ci, 0, 0, 0))
    oshape = jax.ShapeDtypeStruct((nsplit, r, _SUB, _LANE), jnp.float32)

    tp_o, ps_o, ts_o = pl.pallas_call(
        _f1_kernel,
        out_shape=(oshape, oshape, oshape),
        grid_spec=pltpu.PrefetchScalarGridSpec(
            num_scalar_prefetch=0,
            grid=(nsplit, kb),
            in_specs=[ispec, ispec],
            out_specs=(ospec, ospec, ospec)),
        compiler_params=pltpu.CompilerParams(
            dimension_semantics=("parallel", "arbitrary"),
            vmem_limit_bytes=_VMEM_LIMIT),
        cost_estimate=pl.CostEstimate(
            flops=int(6 * r * cols_p), transcendentals=0,
            bytes_accessed=int(t.size * t.dtype.itemsize + x.size * x.dtype.itemsize)),
    )(t, x)
    eps = 1e-8
    tp = jnp.sum(tp_o, axis=(0, 2, 3))
    ps = jnp.sum(ps_o, axis=(0, 2, 3))
    ts = jnp.sum(ts_o, axis=(0, 2, 3))
    precision = tp / (ps + eps)
    recall = tp / (ts + eps)
    return jnp.mean(precision * recall / (precision + recall + eps) * 2.0)


# -------------------- plain-jnp reductions (tiny levels / references) -------------------- #

def _epe_sum_jnp(pred, target, target_scale):
    d = target.astype(jnp.float32) * target_scale - pred.astype(jnp.float32)
    return jnp.sum(jnp.sqrt(jnp.sum(d * d, axis=-3)))


def _bce_sum_jnp(logits, target):
    x = logits.astype(jnp.float32)
    t = target.astype(jnp.float32)
    sp = jnp.maximum(x, 0.0) + jnp.log1p(jnp.exp(-jnp.abs(x)))
    return jnp.sum(sp - t * x)


def _f1_jnp(y_true, occ_logits):
    t = y_true.astype(jnp.float32)
    p = (occ_logits > 0).astype(jnp.float32)
    eps = 1e-8
    tp = jnp.sum(p * t, axis=(-2, -1))
    precision = tp / (jnp.sum(p, axis=(-2, -1)) + eps)
    recall = tp / (jnp.sum(t, axis=(-2, -1)) + eps)
    return jnp.mean(precision * recall / (precision + recall + eps) * 2.0)


# -------------------------- target pyramid (JAX glue) -------------------------- #

def _avg_pool_to(x, h, w):
    """adaptive_avg_pool2d(x, [h, w]) for the exactly-divisible case."""
    H, W = x.shape[-2], x.shape[-1]
    if (H, W) == (h, w):
        return x
    # TODO(synk): adaptive_avg_pool2d with non-divisible (uneven) windows not implemented.
    assert H % h == 0 and W % w == 0
    fh, fw = H // h, W // w
    x = x.reshape(x.shape[:-2] + (h, fh, w, fw))
    return x.mean(axis=(-3, -1))


def _build_target_pyramid(target, sizes):
    """Cascaded pooling: each level is pooled from the smallest already-built level that
    divides it, so the full-resolution target is read from HBM only once."""
    H, W = int(target.shape[-2]), int(target.shape[-1])
    cache = {(H, W): target}
    for (h, w) in sorted({(int(a), int(b)) for (a, b) in sizes},
                         key=lambda s: -(s[0] * s[1])):
        if (h, w) in cache:
            continue
        srcs = [s for s in cache if s[0] % h == 0 and s[1] % w == 0]
        src = cache[min(srcs, key=lambda s: s[0] * s[1])] if srcs else target
        cache[(h, w)] = _avg_pool_to(src, h, w)
    return cache


def _level_reductions(flow_items, occ_items, flow_pyr, occ_pyr, div_flow):
    """flow_items/occ_items: {(h, w): [(key, pred), ...]}.  Returns per-key scalar sums.
    Large levels -> one fused Pallas call per resolution; tiny levels -> plain jnp."""
    epe_res, bce_res = {}, {}
    for hw in sorted(set(flow_items) | set(occ_items), key=lambda s: -(s[0] * s[1])):
        fitems = flow_items.get(hw, [])
        oitems = occ_items.get(hw, [])
        if hw[0] * hw[1] >= _MIN_PALLAS_PIXELS:
            epe_sums, bce_sums = _fused_level_sums_pallas(
                flow_pyr[hw] if fitems else None, [a for _, a in fitems],
                occ_pyr[hw] if oitems else None, [a for _, a in oitems],
                div_flow)
        else:
            epe_sums = [_epe_sum_jnp(a, flow_pyr[hw], div_flow) for _, a in fitems]
            bce_sums = [_bce_sum_jnp(a, occ_pyr[hw]) for _, a in oitems]
        for (key, _), s in zip(fitems, epe_sums):
            epe_res[key] = s
        for (key, _), s in zip(oitems, bce_sums):
            bce_res[key] = s
    return epe_res, bce_res


# --------------------------------- loss module --------------------------------- #

class MultiScaleEPE_PWC_Occ_video_upsample_Sintel:
    # TODO(synk): forward-only — the Pallas reductions define no custom_vjp, so this loss
    # is not differentiable as-is (a backward kernel / custom VJP is needed for training).

    def __init__(self, args):
        self._args = args
        self._batch_size = args.batch_size
        self._weights = _WEIGHTS
        self.training = True

    def __call__(self, output_dict, target_dict):
        loss_dict = {}
        if self.training:
            outputs_flo = output_dict['flow']                   # list of [NF, B, 2, h, w]
            outputs_occ = output_dict['occ']                    # list of [NF, B, 1, h, w]
            outputs_flo_coarse = output_dict['flow_coarse']
            outputs_occ_coarse = output_dict['occ_coarse']
            div_flow = float(self._args.model_div_flow)         # folded into the kernel

            targets_flo = jnp.stack(target_dict['target_flows'], 0)   # [NF, B, 2, H, W]
            targets_occ = jnp.stack(target_dict['target_occs'], 0)    # [NF, B, 1, H, W]

            # Group predictions by resolution so each target pyramid level is built and
            # streamed exactly once (fine + coarse fused into one pallas_call per level).
            flow_items, occ_items = {}, {}

            def add(dct, tag, preds, limit):
                for ii in range(min(limit, len(preds))):
                    a = preds[ii]
                    hw = (int(a.shape[-2]), int(a.shape[-1]))
                    dct.setdefault(hw, []).append(((tag, ii), a))

            add(flow_items, 'fine', outputs_flo, len(outputs_flo))
            add(flow_items, 'coarse', outputs_flo_coarse, len(outputs_flo))
            add(occ_items, 'fine', outputs_occ, len(outputs_occ))
            add(occ_items, 'coarse', outputs_occ_coarse, len(outputs_occ))

            flow_pyr = _build_target_pyramid(targets_flo, flow_items.keys())
            occ_pyr = _build_target_pyramid(targets_occ, occ_items.keys())

            epe_res, bce_res = _level_reductions(
                flow_items, occ_items, flow_pyr, occ_pyr, div_flow)

            flow_loss = jnp.float32(0.0)
            for ii, out_ii in enumerate(outputs_flo):
                nframes = out_ii.shape[0]
                loss_ii = epe_res[('fine', ii)]
                if ii < len(outputs_flo_coarse):
                    loss_ii = (loss_ii + epe_res[('coarse', ii)]) / 2.0
                flow_loss = flow_loss + self._weights[ii] * (loss_ii / nframes)

            occ_loss = jnp.float32(0.0)
            for ii, out_ii in enumerate(outputs_occ):
                nframes = out_ii.shape[0]
                loss_ii = bce_res[('fine', ii)]
                if ii < len(outputs_occ_coarse):
                    loss_ii = (loss_ii + bce_res[('coarse', ii)]) / 2.0
                occ_loss = occ_loss + self._weights[ii] * (loss_ii / nframes)

            f_loss = jax.lax.stop_gradient(flow_loss)
            o_loss = jax.lax.stop_gradient(occ_loss)
            # NOTE: reference has `if (f_loss.data > o_loss.data).numpy:` — a bound method,
            # hence always truthy — so that branch is taken unconditionally.
            f_l_w = 1.0
            o_l_w = f_loss / o_loss
            loss_dict['flow_loss'] = flow_loss / self._batch_size
            loss_dict['occ_loss'] = occ_loss / self._batch_size
            loss_dict['total_loss'] = (flow_loss * f_l_w + occ_loss * o_l_w) / self._batch_size
        else:
            flow = output_dict['flow'][-1]                      # [B, 2, H, W]
            tflow = target_dict['target_flows'][-1]
            h, w = int(flow.shape[-2]), int(flow.shape[-1])
            if h * w >= _MIN_PALLAS_PIXELS:
                epe_sums, _ = _fused_level_sums_pallas(tflow, [flow], None, [], 1.0)
                epe_total = epe_sums[0]
            else:
                epe_total = _epe_sum_jnp(flow, tflow, 1.0)
            loss_dict['epe'] = epe_total / (flow.shape[0] * 1 * h * w)

            y_true = target_dict['target_occs'][-1]             # [B, 1, H, W]
            occ_logits = output_dict['occ'][-1]
            if y_true.shape[-2] * y_true.shape[-1] >= _MIN_PALLAS_PIXELS:
                loss_dict['F1'] = _f1_pallas(y_true, occ_logits)
            else:
                loss_dict['F1'] = _f1_jnp(y_true, occ_logits)
        return loss_dict


# ------------------------------------- demo ------------------------------------- #

if __name__ == "__main__":
    class Args:
        batch_size = 2
        model_div_flow = 0.05

    args = Args()

    def _check_close(name, got, want, rtol=1e-3, atol=1e-2):
        g, w_ = float(got), float(want)
        assert abs(g - w_) <= atol + rtol * abs(w_), f"{name}: got {g}, want {w_}"

    key = jax.random.PRNGKey(0)
    B, NF, H, W = 2, 2, 128, 128
    fine_scales = [(128, 128), (64, 64), (32, 32)]
    coarse_scales = [(128, 128), (64, 64)]

    keys = jax.random.split(key, 32)
    kit = iter(keys)

    target_flows = [jax.random.normal(next(kit), (B, 2, H, W), jnp.float32) * 5.0
                    for _ in range(NF)]
    target_occs = [jnp.round(jax.random.uniform(next(kit), (B, 1, H, W), jnp.float32))
                   for _ in range(NF)]

    outputs_flo = [jax.random.normal(next(kit), (NF, B, 2, h, w), jnp.float32)
                   for (h, w) in fine_scales]
    outputs_flo_coarse = [jax.random.normal(next(kit), (NF, B, 2, h, w), jnp.float32)
                          for (h, w) in coarse_scales]
    outputs_occ = [jax.random.normal(next(kit), (NF, B, 1, h, w), jnp.float32)
                   for (h, w) in fine_scales]
    outputs_occ_coarse = [jax.random.normal(next(kit), (NF, B, 1, h, w), jnp.float32)
                          for (h, w) in coarse_scales]

    output_dict = {'flow': outputs_flo, 'occ': outputs_occ,
                   'flow_coarse': outputs_flo_coarse, 'occ_coarse': outputs_occ_coarse}
    target_dict = {'target_flows': target_flows, 'target_occs': target_occs}

    ft_stack = jnp.stack(target_flows, 0)     # (NF, B, 2, H, W)
    ot_stack = jnp.stack(target_occs, 0)      # (NF, B, 1, H, W)

    # --- unit checks: exercise the multi-block + dual-core-split grid path -----------
    epe_p, bce_p = _fused_level_sums_pallas(
        ft_stack, [outputs_flo[0]], ot_stack, [outputs_occ[0]],
        args.model_div_flow, tile_bytes=256 * 1024)            # forces grid = (2, >1)
    _check_close("epe_sum", epe_p[0],
                 _epe_sum_jnp(outputs_flo[0], ft_stack, args.model_div_flow))
    _check_close("bce_sum", bce_p[0], _bce_sum_jnp(outputs_occ[0], ot_stack))

    f1_p = _f1_pallas(target_occs[-1], outputs_occ[0][0], tile_bytes=64 * 1024)
    _check_close("f1", f1_p, _f1_jnp(target_occs[-1], outputs_occ[0][0]),
                 rtol=1e-4, atol=1e-4)

    loss = MultiScaleEPE_PWC_Occ_video_upsample_Sintel(args)

    # --- training branch ---------------------------------------------------------------
    train_fn = jax.jit(lambda od, td: loss(od, td))
    out_train = train_fn(output_dict, target_dict)
    jax.block_until_ready(out_train)

    def _ref_train_losses():
        fl = jnp.float32(0.0)
        ol = jnp.float32(0.0)
        for ii, out_ii in enumerate(outputs_flo):
            nf = out_ii.shape[0]
            l = _epe_sum_jnp(out_ii, _avg_pool_to(ft_stack, *fine_scales[ii]),
                             args.model_div_flow)
            if ii < len(outputs_flo_coarse):
                l = (l + _epe_sum_jnp(outputs_flo_coarse[ii],
                                      _avg_pool_to(ft_stack, *coarse_scales[ii]),
                                      args.model_div_flow)) / 2.0
            fl = fl + _WEIGHTS[ii] * (l / nf)
        for ii, out_ii in enumerate(outputs_occ):
            nf = out_ii.shape[0]
            l = _bce_sum_jnp(out_ii, _avg_pool_to(ot_stack, *fine_scales[ii]))
            if ii < len(outputs_occ_coarse):
                l = (l + _bce_sum_jnp(outputs_occ_coarse[ii],
                                      _avg_pool_to(ot_stack, *coarse_scales[ii]))) / 2.0
            ol = ol + _WEIGHTS[ii] * (l / nf)
        return fl / args.batch_size, ol / args.batch_size

    ref_fl, ref_ol = _ref_train_losses()
    _check_close("flow_loss", out_train['flow_loss'], ref_fl)
    _check_close("occ_loss", out_train['occ_loss'], ref_ol)

    # --- eval branch ---------------------------------------------------------------------
    loss.training = False
    eval_output_dict = {
        'flow': [jax.random.normal(next(kit), (B, 2, H, W), jnp.float32)],
        'occ': [jax.random.normal(next(kit), (B, 1, H, W), jnp.float32)],
    }
    eval_fn = jax.jit(lambda od, td: loss(od, td))
    out_eval = eval_fn(eval_output_dict, target_dict)
    jax.block_until_ready(out_eval)
    _check_close("eval_epe", out_eval['epe'],
                 _epe_sum_jnp(eval_output_dict['flow'][0], target_flows[-1], 1.0)
                 / (B * H * W))
    _check_close("eval_f1", out_eval['F1'],
                 _f1_jnp(target_occs[-1], eval_output_dict['occ'][0]),
                 rtol=1e-4, atol=1e-4)

    print("KERNEL_OK")
</pallas_src>

<mosaic_0001>
module attributes {stable_mosaic.version = 11 : i64} {
  func.func @kernel(%arg0: i32, %arg1: i32, %arg2: memref<4x2x16x128xf32, #tpu.memory_space<vmem>>, %arg3: memref<4x2x16x128xf32, #tpu.memory_space<vmem>>, %arg4: memref<4x16x128xf32, #tpu.memory_space<vmem>>, %arg5: memref<4x16x128xf32, #tpu.memory_space<vmem>>, %arg6: memref<8x128xf32, #tpu.memory_space<vmem>>, %arg7: memref<8x128xf32, #tpu.memory_space<vmem>>) attributes {dimension_semantics = [#tpu.dimension_semantics<parallel>, #tpu.dimension_semantics<arbitrary>], iteration_bounds = array<i64: 2, 4>, scalar_prefetch = 0 : i64, scratch_operands = 0 : i64, tpu.core_type = #tpu.core_type<tc>, window_params = [{transform_indices = @transform_0, window_bounds = array<i64: 4, 2, 16, 128>}, {transform_indices = @transform_1, window_bounds = array<i64: 4, 2, 16, 128>}, {transform_indices = @transform_2, window_bounds = array<i64: 4, 16, 128>}, {transform_indices = @transform_3, window_bounds = array<i64: 4, 16, 128>}, {transform_indices = @transform_4, window_bounds = array<i64: 8, 128>}, {transform_indices = @transform_5, window_bounds = array<i64: 8, 128>}]} {
    %c0_i32 = arith.constant 0 : i32
    %0 = arith.cmpi eq, %arg1, %c0_i32 : i32
    %1 = arith.extui %0 : i1 to i32
    %c0_i32_0 = arith.constant 0 : i32
    %2 = arith.cmpi ne, %1, %c0_i32_0 : i32
    scf.if %2 {
      %cst_28 = arith.constant 0.000000e+00 : f32
      %35 = vector.broadcast %cst_28 : f32 to vector<8x128xf32>
      %c0_29 = arith.constant 0 : index
      %c0_30 = arith.constant 0 : index
      %36 = vector.load %arg6[%c0_29, %c0_30] : memref<8x128xf32, #tpu.memory_space<vmem>>, vector<8x128xf32>
      tpu.vector_store %arg6[%c0_29, %c0_30], %35 {strides = array<i32>} : memref<8x128xf32, #tpu.memory_space<vmem>>, vector<8x128xf32>,
      %cst_31 = arith.constant 0.000000e+00 : f32
      %37 = vector.broadcast %cst_31 : f32 to vector<8x128xf32>
      %c0_32 = arith.constant 0 : index
      %c0_33 = arith.constant 0 : index
      %38 = vector.load %arg7[%c0_32, %c0_33] : memref<8x128xf32, #tpu.memory_space<vmem>>, vector<8x128xf32>
      tpu.vector_store %arg7[%c0_32, %c0_33], %37 {strides = array<i32>} : memref<8x128xf32, #tpu.memory_space<vmem>>, vector<8x128xf32>,
    } else {
    }
    %c0 = arith.constant 0 : index
    %c0_1 = arith.constant 0 : index
    %c0_2 = arith.constant 0 : index
    %c0_3 = arith.constant 0 : index
    %3 = vector.load %arg2[%c0, %c0_1, %c0_2, %c0_3] : memref<4x2x16x128xf32, #tpu.memory_space<vmem>>, vector<4x2x16x128xf32>
    %cst = arith.constant 5.000000e-02 : f32
    %4 = vector.broadcast %cst : f32 to vector<4x2x16x128xf32>
    %5 = arith.mulf %3, %4 : vector<4x2x16x128xf32>
    %c0_4 = arith.constant 0 : index
    %c0_5 = arith.constant 0 : index
    %c0_6 = arith.constant 0 : index
    %c0_7 = arith.constant 0 : index
    %6 = vector.load %arg3[%c0_4, %c0_5, %c0_6, %c0_7] : memref<4x2x16x128xf32, #tpu.memory_space<vmem>>, vector<4x2x16x128xf32>
    %7 = arith.subf %5, %6 : vector<4x2x16x128xf32>
    %8 = arith.mulf %7, %7 : vector<4x2x16x128xf32>
    %cst_8 = arith.constant dense<0.000000e+00> : vector<4x16x128xf32>
    %9 = vector.multi_reduction <add>, %8, %cst_8 [1] : vector<4x2x16x128xf32> to vector<4x16x128xf32>
    %10 = math.sqrt %9 : vector<4x16x128xf32>
    %c0_9 = arith.constant 0 : index
    %c0_10 = arith.constant 0 : index
    %11 = vector.load %arg6[%c0_9, %c0_10] : memref<8x128xf32, #tpu.memory_space<vmem>>, vector<8x128xf32>
    %12 = vector.shape_cast %10 : vector<4x16x128xf32> to vector<8x8x128xf32>
    %cst_11 = arith.constant dense<0.000000e+00> : vector<8x128xf32>
    %13 = vector.multi_reduction <add>, %12, %cst_11 [0] : vector<8x8x128xf32> to vector<8x128xf32>
    %14 = arith.addf %11, %13 : vector<8x128xf32>
    %c0_12 = arith.constant 0 : index
    %c0_13 = arith.constant 0 : index
    %15 = vector.load %arg6[%c0_12, %c0_13] : memref<8x128xf32, #tpu.memory_space<vmem>>, vector<8x128xf32>
    tpu.vector_store %arg6[%c0_12, %c0_13], %14 {strides = array<i32>} : memref<8x128xf32, #tpu.memory_space<vmem>>, vector<8x128xf32>,
    %c0_14 = arith.constant 0 : index
    %c0_15 = arith.constant 0 : index
    %c0_16 = arith.constant 0 : index
    %16 = vector.load %arg4[%c0_14, %c0_15, %c0_16] : memref<4x16x128xf32, #tpu.memory_space<vmem>>, vector<4x16x128xf32>
    %c0_17 = arith.constant 0 : index
    %c0_18 = arith.constant 0 : index
    %c0_19 = arith.constant 0 : index
    %17 = vector.load %arg5[%c0_17, %c0_18, %c0_19] : memref<4x16x128xf32, #tpu.memory_space<vmem>>, vector<4x16x128xf32>
    %cst_20 = arith.constant 0.000000e+00 : f32
    %18 = vector.broadcast %cst_20 : f32 to vector<4x16x128xf32>
    %19 = arith.maximumf %17, %18 : vector<4x16x128xf32>
    %20 = math.absf %17 : vector<4x16x128xf32>
    %cst_21 = arith.constant 0.000000e+00 : f32
    %21 = vector.broadcast %cst_21 : f32 to vector<4x16x128xf32>
    %22 = arith.subf %21, %20 : vector<4x16x128xf32>
    %23 = math.exp %22 : vector<4x16x128xf32>
    %cst_22 = arith.constant 1.000000e+00 : f32
    %24 = vector.broadcast %cst_22 : f32 to vector<4x16x128xf32>
    %25 = arith.addf %24, %23 : vector<4x16x128xf32>
    %26 = math.log %25 : vector<4x16x128xf32>
    %27 = arith.addf %19, %26 : vector<4x16x128xf32>
    %c0_23 = arith.constant 0 : index
    %c0_24 = arith.constant 0 : index
    %28 = vector.load %arg7[%c0_23, %c0_24] : memref<8x128xf32, #tpu.memory_space<vmem>>, vector<8x128xf32>
    %29 = arith.mulf %16, %17 : vector<4x16x128xf32>
    %30 = arith.subf %27, %29 : vector<4x16x128xf32>
    %31 = vector.shape_cast %30 : vector<4x16x128xf32> to vector<8x8x128xf32>
    %cst_25 = arith.constant dense<0.000000e+00> : vector<8x128xf32>
    %32 = vector.multi_reduction <add>, %31, %cst_25 [0] : vector<8x8x128xf32> to vector<8x128xf32>
    %33 = arith.addf %28, %32 : vector<8x128xf32>
    %c0_26 = arith.constant 0 : index
    %c0_27 = arith.constant 0 : index
    %34 = vector.load %arg7[%c0_26, %c0_27] : memref<8x128xf32, #tpu.memory_space<vmem>>, vector<8x128xf32>
    tpu.vector_store %arg7[%c0_26, %c0_27], %33 {strides = array<i32>} : memref<8x128xf32, #tpu.memory_space<vmem>>, vector<8x128xf32>,
    return
  }
  func.func @transform_0(%arg0: i32, %arg1: i32) -> (i32, i32, i32, i32) {
    %c4_i32 = arith.constant 4 : i32
    %0 = arith.muli %arg0, %c4_i32 : i32
    %1 = arith.addi %0, %arg1 : i32
    %c0_i32 = arith.constant 0 : i32
    %c0_i32_0 = arith.constant 0 : i32
    %c0_i32_1 = arith.constant 0 : i32
    %c0_i32_2 = arith.constant 0 : i32
    return %c0_i32, %c0_i32_0, %1, %c0_i32_1 : i32, i32, i32, i32
  }
  func.func @transform_1(%arg0: i32, %arg1: i32) -> (i32, i32, i32, i32) {
    %c4_i32 = arith.constant 4 : i32
    %0 = arith.muli %arg0, %c4_i32 : i32
    %1 = arith.addi %0, %arg1 : i32
    %c0_i32 = arith.constant 0 : i32
    %c0_i32_0 = arith.constant 0 : i32
    %c0_i32_1 = arith.constant 0 : i32
    %c0_i32_2 = arith.constant 0 : i32
    return %c0_i32, %c0_i32_0, %1, %c0_i32_1 : i32, i32, i32, i32
  }
  func.func @transform_2(%arg0: i32, %arg1: i32) -> (i32, i32, i32) {
    %c4_i32 = arith.constant 4 : i32
    %0 = arith.muli %arg0, %c4_i32 : i32
    %1 = arith.addi %0, %arg1 : i32
    %c0_i32 = arith.constant 0 : i32
    %c0_i32_0 = arith.constant 0 : i32
    %c0_i32_1 = arith.constant 0 : i32
    return %c0_i32, %1, %c0_i32_0 : i32, i32, i32
  }
  func.func @transform_3(%arg0: i32, %arg1: i32) -> (i32, i32, i32) {
    %c4_i32 = arith.constant 4 : i32
    %0 = arith.muli %arg0, %c4_i32 : i32
    %1 = arith.addi %0, %arg1 : i32
    %c0_i32 = arith.constant 0 : i32
    %c0_i32_0 = arith.constant 0 : i32
    %c0_i32_1 = arith.constant 0 : i32
    return %c0_i32, %1, %c0_i32_0 : i32, i32, i32
  }
  func.func @transform_4(%arg0: i32, %arg1: i32) -> (i32, i32) {
    %c0_i32 = arith.constant 0 : i32
    %c0_i32_0 = arith.constant 0 : i32
    return %arg0, %c0_i32 : i32, i32
  }
  func.func @transform_5(%arg0: i32, %arg1: i32) -> (i32, i32) {
    %c0_i32 = arith.constant 0 : i32
    %c0_i32_0 = arith.constant 0 : i32
    return %arg0, %c0_i32 : i32, i32
  }
}

</mosaic_0001>

<bundles_post_ra>
// kernel: tpu_custom_call.1
= control target key start
LH: loop header
LB: loop body
LE: loop exit
PB: predicated region body
PF: predicated region fallthrough
CT: control target
= control target key end

     0   :  { %s2068_s0 = inlined_call_operand.hbm [shape: f32[4,2,128,128], index: 0, kind: input, shape index: {}]   ;;  %s2069_s1 = inlined_call_operand.hbm [shape: f32[4,2,128,128], index: 1, kind: input, shape index: {}]   ;;  %s2070_s2 = inlined_call_operand.hbm [shape: f32[4,128,128], index: 2, kind: input, shape index: {}]   ;;  %s2071_s3 = inlined_call_operand.hbm [shape: f32[4,128,128], index: 3, kind: input, shape index: {}]   ;;  %s2072_s4 = inlined_call_operand.hbm [shape: f32[16,128], index: 4, kind: output, shape index: {0}]   ;;  %s2073_s5 = inlined_call_operand.hbm [shape: f32[16,128], index: 5, kind: output, shape index: {1}]  }
   0x1   :  { %2081 = sst [smem:[#allocation38_spill]] %s2068_s0 }
   0x2   :  { %2082 = sst [smem:[#allocation39_spill]] %s2073_s5 }
   0x3   :  { %11 = vsyncpa [#allocation3], 0 }
   0x4   :  { %13 = vsyncpa [#allocation3 + $0x1], 0 }
   0x5   :  { %14 = vsyncpa [#allocation6], 0 }
   0x6   :  { %16 = vsyncpa [#allocation6 + $0x1], 0 }
   0x7   :  { %17 = vsyncpa [#allocation9], 0 }
   0x8   :  { %19 = vsyncpa [#allocation9 + $0x1], 0 }
   0x9   :  { %20 = vsyncpa [#allocation4], 0 }
   0xa   :  { %22 = vsyncpa [#allocation4 + $0x1], 0 }
   0xb   :  { %23 = vsyncpa [#allocation12], 0 }
   0xc   :  { %25 = vsyncpa [#allocation12 + $0x1], 0  ;;  %s1546_s18 = smov 0   ;;  %s1548_s19 = smov 0  }
   0xd   :  { %s1550_s20 = smov 0   ;;  %s1552_s21 = smov 0  }
   0xe   :  { %s1554_s22 = smov 0   ;;  %s1556_s23 = smov 0  }
   0xf   :  { %s1558_s24 = smov 0   ;;  %s1560_s25 = smov 0  }
  0x10   :  { %s1562_s26 = smov 0   ;;  %s1564_s27 = smov 0  }
  0x11   :  { %s1566_s28 = smov 0  }
  0x12 LB: > { %2083 = sst [smem:[#allocation30_spill]] %s1457_s20  ;;  %s1600_s29 = sadd.s32 4294967295, %s1489_s28   ;;  %s1489_s28 = sphi %s1566_s28, %s31_s28   ;;  %s1485_s27 = sphi %s1564_s27, %s2105_s27   ;;  %s1481_s26 = sphi %s1562_s26, %s2104_s26   ;;  %s1477_s25 = sphi %s1560_s25, %s2103_s25   ;;  %s1473_s24 = sphi %s1558_s24, %s2102_s24   ;;  %s1469_s23 = sphi %s1556_s23, %s2101_s23   ;;  %s1465_s22 = sphi %s1554_s22, %s2109_s22   ;;  %s1461_s21 = sphi %s1552_s21, %s2108_s21   ;;  %s1457_s20 = sphi %s1550_s20, %s2099_s20   ;;  %s1453_s19 = sphi %s1548_s19, %s2107_s19   ;;  %s1449_s18 = sphi %s1546_s18, %s2106_s18  }
  0x13   : > { %2084 = sst [smem:[#allocation31_spill]] %s1469_s23  ;;  %s40_s6 = sadd.s32 1, %s1481_s26 }
  0x14   : > { %2085 = sst [smem:[#allocation32_spill]] %s1481_s26  ;;  %s43_s7 = sadd.s32 1, %s1485_s27 }
  0x15   : > { %2086 = sst [smem:[#allocation33_spill]] %s1485_s27  ;;  %p41_p0 = scmp.ge.s32.totalorder %s40_s6, 4 }
  0x16   : > { %s1066_s8 = sshll.u32 %s1485_s27, 2  ;;  %s54_s10 = sadd.s32 1, %s1469_s23 }
  0x17   : > { %s1607_s9 = sadd.s32 %s1481_s26, %s1066_s8  ;;  %s2111_s6 = smov (%p41_p0, %s40_s6), 0 }
  0x18   : > { %2087 = sst [smem:[#allocation34_spill]] %s2111_s6  ;;  %s2113_s7 = smov (!%p41_p0, %s43_s7), %s1485_s27 }
  0x19   : > { %p61_p1 = scmp.ne.s32.totalorder %s1469_s23, %s1465_s22  ;;  %p62_p2 = scmp.eq.s32.totalorder %s1489_s28, 0 }
  0x1a   : > { %p45_p3 = scmp.ge.s32.totalorder %s2113_s7, 2  ;;  %p67_p4 = scmp.ne.s32.totalorder %s1465_s22, %s1461_s21 }
  0x1b   : > { %p1617_p5 = por %p62_p2, %p61_p1  ;;  %p68_p6 = scmp.eq.s32.totalorder %s1600_s29, 0 }
  0x1c   : > { %s2115_s7 = smov (%p45_p3, %s2113_s7), 0  ;;  %s170_s13 = sadd.s32 1, %s1457_s20 }
  0x1d   : > { %2089 = sst [smem:[#allocation35_spill]] %s2115_s7  ;;  %p1624_p7 = por %p68_p6, %p67_p4 }
  0x1e   : > { %s1067_s14 = sshll.u32 %s2115_s7, 2  ;;  %s167_s15 = ssub.s32 %s1485_s27, %s2115_s7 }
  0x1f   : > { %s50_s16 = sadd.s32 %s1067_s14, %s2111_s6  ;;  %p168_p8 = scmp.eq.s32.totalorder %s167_s15, 0 }
  0x20   : > { %s51_s17 = ssub.s32 %s1607_s9, %s50_s16  ;;  %p180_p9 = scmp.ne.s32.totalorder %s1457_s20, %s1453_s19 }
  0x21   : > { %p52_p10 = scmp.eq.s32.totalorder %s51_s17, 0  ;;  %p181_p11 = scmp.eq.s32.totalorder %s1600_s29, 7 }
  0x22   : > { %s1638_s21 = scalar_select %p168_p8, %s1457_s20, %s170_s13  }
  0x23   : > { %s1641_s8 = scalar_select %p52_p10, %s1469_s23, %s54_s10  }
  0x24   : > { %2091 = sst [smem:[#allocation36_spill]] %s1638_s21  ;;  %p1643_p12 = por %p181_p11, %p180_p9 }
  0x25   : > { %2092 = sst [smem:[#allocation37_spill]] %s1641_s8  ;;  %p186_p13 = scmp.ne.s32.totalorder %s1453_s19, %s1449_s18 }
  0x26   : > { %s2094_s26 = sadd.s32 4294967294, %s1489_s28   ;;  %p1075_p2 = scmp.ge.s32.totalorder %s1489_s28, 8 }
  0x27   : > { %p187_p0 = scmp.eq.s32.totalorder %s2094_s26, 7 }
  0x28   : > { %229 = sbr.rel (%p1075_p2) target bundleno = 98 (0x62), region = 16 }
  0x29   : > { %p1651_p1 = por %p187_p0, %p186_p13 }
  0x2d   : > { %s1657_s10 = sand.u32 1, %s1469_s23   ;;  %s1660_s13 = sshll.u32 %s1607_s9, 4 }
  0x2e   : > { %s1076_s26 = sshll.u32 %s1657_s10, 7  ;;  %s2096_s0 = sld [smem:[#allocation38_spill]] }
  0x2f   : > { %s1118_s17 = scalar_select %p1617_p5, [#allocation0], [#allocation21] }
  0x30   : > { %s237_s6 = scalar_lea.vmem [#allocation2], %s1076_s26  ;;  %s1491_s9 = smov 2048  }
  0x31   : > { %s259_s27 = sshll.u32 %s237_s6, 4  ;;  %s249_s8 = sld [smem:[%s1118_s17]]   ;;  %s260_s27 = int_to_ptr.vmem [resolvable:$true] %s259_s27 }
  0x32   : > { %1119 = sst [smem:[#allocation14]] (%p1617_p5), %s1491_s9  ;;  %s1492_s23 = smov 256  }
  0x33   : > { %1120 = sst [smem:[#allocation14 + $0x1]] (%p1617_p5), %s1492_s23  ;;  %s1493_s14 = smov 2  }
  0x34   : > { %s244_s16 = scalar_lea.hbm %s2096_s0, %s1660_s13  ;;  %1121 = sst [smem:[#allocation14 + $0x2]] (%p1617_p5), %s1493_s14 }
  0x35   : > { %s257_s7 = sshll.u32 %s244_s16, 4  ;;  %s1494_s15 = smov 128   ;;  %s258_s7 = int_to_ptr.hbm [resolvable:$true] %s257_s7 }
  0x36   : > { %1122 = sst [smem:[#allocation14 + $0x3]] (%p1617_p5), %s1494_s15  ;;  %s1495_s17 = smov 8  }
  0x37   : > { %s1080_s16 = sshll.u32 %s249_s8, 26  ;;  %1123 = sst [smem:[#allocation14 + $0x4]] (%p1617_p5), %s1494_s15 }
  0x38   : > { %s1081_s6 = sadd.s32 134217728, %s1080_s16  ;;  %1124 = sst [smem:[#allocation14 + $0x5]] (%p1617_p5), %s1495_s17 }
  0x39   : > { %s234_s0 = scalar_lea.sflag [#allocation3], %s1657_s10  ;;  %s1496_s21 = smov [#allocation13]  }
  0x3a   : > { %1125 = dma.general (%p1617_p5), %s258_s7, 2048, %s260_s27, %s234_s0, %s1496_s21, [#allocation14], %s1081_s6, 0  }
  0x3b   : > { %s282_s23 = sand.u32 1, %s1489_s28   ;;  %s293_s8 = scalar_lea.hbm %s2069_s1, %s1660_s13 }
  0x3c   : > { %s1126_s15 = scalar_select %p1617_p5, [#allocation0], [#allocation22] }
  0x3d   : > { %s306_s16 = sshll.u32 %s293_s8, 4  ;;  %s286_s17 = scalar_lea.vmem [#allocation5], %s1076_s26  ;;  %s307_s16 = int_to_ptr.hbm [resolvable:$true] %s306_s16 }
  0x3e   : > { %s308_s20 = sshll.u32 %s286_s17, 4  ;;  %s298_s0 = sld [smem:[%s1126_s15]]   ;;  %s309_s20 = int_to_ptr.vmem [resolvable:$true] %s308_s20 }
  0x3f   : > { %s1497_s27 = smov 2048   ;;  %s1498_s7 = smov 256  }
  0x40   : > { %1127 = sst [smem:[#allocation16]] (%p1617_p5), %s1497_s27  ;;  %s1499_s21 = smov 2  }
  0x41   : > { %1128 = sst [smem:[#allocation16 + $0x1]] (%p1617_p5), %s1498_s7  ;;  %s1500_s6 = smov 128  }
  0x42   : > { %1129 = sst [smem:[#allocation16 + $0x2]] (%p1617_p5), %s1499_s21  ;;  %s1501_s14 = smov 8  }
  0x43   : > { %1130 = sst [smem:[#allocation16 + $0x3]] (%p1617_p5), %s1500_s6  ;;  %s1703_s8 = scalar_lea.sflag [#allocation6], %s282_s23 }
  0x44   : > { %s1086_s9 = sshll.u32 %s298_s0, 26  ;;  %1131 = sst [smem:[#allocation16 + $0x4]] (%p1617_p5), %s1500_s6 }
  0x45   : > { %s1087_s26 = sadd.s32 134217728, %s1086_s9  ;;  %1132 = sst [smem:[#allocation16 + $0x5]] (%p1617_p5), %s1501_s14 }
  0x46   : > { %s1502_s15 = smov [#allocation15]  }
  0x47   : > { %1133 = dma.general (%p1617_p5), %s307_s16, 2048, %s309_s20, %s1703_s8, %s1502_s15, [#allocation16], %s1087_s26, 0  }
  0x48   : > { %s1088_s17 = sshll.u32 %s1657_s10, 6  ;;  %s342_s7 = scalar_lea.hbm %s2070_s2, %s1660_s13 }
  0x49   : > { %s355_s21 = sshll.u32 %s342_s7, 4  ;;  %s335_s6 = scalar_lea.vmem [#allocation7], %s1088_s17  ;;  %s356_s21 = int_to_ptr.hbm [resolvable:$true] %s355_s21 }
  0x4a   : > { %s1134_s23 = scalar_select %p1617_p5, [#allocation0], [#allocation23] }
  0x4b   : > { %s357_s20 = sshll.u32 %s335_s6, 4  ;;  %s1503_s9 = smov 2048   ;;  %s358_s20 = int_to_ptr.vmem [resolvable:$true] %s357_s20 }
  0x4c   : > { %s347_s16 = sld [smem:[%s1134_s23]]   ;;  %s1504_s26 = smov 256  }
  0x4d   : > { %1135 = sst [smem:[#allocation18]] (%p1617_p5), %s1503_s9  ;;  %s1505_s14 = smov 2  }
  0x4e   : > { %1136 = sst [smem:[#allocation18 + $0x1]] (%p1617_p5), %s1504_s26  ;;  %s1506_s15 = smov 128  }
  0x4f   : > { %1137 = sst [smem:[#allocation18 + $0x2]] (%p1617_p5), %s1505_s14  ;;  %s1507_s7 = smov 8  }
  0x50   : > { %1138 = sst [smem:[#allocation18 + $0x3]] (%p1617_p5), %s1506_s15  ;;  %s1508_s23 = smov [#allocation17]  }
  0x51   : > { %1139 = sst [smem:[#allocation18 + $0x4]] (%p1617_p5), %s1506_s15 }
  0x52   : > { %s1092_s0 = sshll.u32 %s347_s16, 26  ;;  %1140 = sst [smem:[#allocation18 + $0x5]] (%p1617_p5), %s1507_s7 }
  0x53   : > { %s1093_s27 = sadd.s32 134217728, %s1092_s0 }
  0x54   : > { %1141 = dma.general (%p1617_p5), %s356_s21, 1024, %s358_s20, %s1703_s8, %s1508_s23, [#allocation18], %s1093_s27, 0  }
  0x55   : > { %s391_s26 = scalar_lea.hbm %s2071_s3, %s1660_s13  ;;  %s384_s16 = scalar_lea.vmem [#allocation8], %s1088_s17 }
  0x56   : > { %s406_s14 = sshll.u32 %s384_s16, 4  ;;  %s404_s0 = sshll.u32 %s391_s26, 4  ;;  %s407_s14 = int_to_ptr.vmem [resolvable:$true] %s406_s14  ;;  %s405_s0 = int_to_ptr.hbm [resolvable:$true] %s404_s0 }
  0x57   : > { %s1142_s15 = scalar_select %p1617_p5, [#allocation0], [#allocation24] }
  0x58   : > { %s1509_s21 = smov 2048   ;;  %s1510_s20 = smov 256  }
  0x59   : > { %s396_s8 = sld [smem:[%s1142_s15]]   ;;  %s1511_s27 = smov 2  }
  0x5a   : > { %1143 = sst [smem:[#allocation20]] (%p1617_p5), %s1509_s21  ;;  %s1512_s13 = smov 128  }
  0x5b   : > { %1144 = sst [smem:[#allocation20 + $0x1]] (%p1617_p5), %s1510_s20  ;;  %s1513_s23 = smov 8  }
  0x5c   : > { %1145 = sst [smem:[#allocation20 + $0x2]] (%p1617_p5), %s1511_s27  ;;  %s381_s6 = scalar_lea.sflag [#allocation9], %s1657_s10 }
  0x5d   : > { %1146 = sst [smem:[#allocation20 + $0x3]] (%p1617_p5), %s1512_s13  ;;  %s1514_s9 = smov [#allocation19]  }
  0x5e   : > { %1147 = sst [smem:[#allocation20 + $0x4]] (%p1617_p5), %s1512_s13 }
  0x5f   : > { %s1098_s17 = sshll.u32 %s396_s8, 26  ;;  %1148 = sst [smem:[#allocation20 + $0x5]] (%p1617_p5), %s1513_s23 }
  0x60   : > { %s1099_s7 = sadd.s32 134217728, %s1098_s17 }
  0x61   : > { %1149 = dma.general (%p1617_p5), %s405_s0, 1024, %s407_s14, %s381_s6, %s1514_s9, [#allocation20], %s1099_s7, 0  }
  0x62 PF: > { %p1100_p3 = scmp.ge.s32.totalorder %s1489_s28, 1  ;;  %p427_p4 = scmp.lt.s32.totalorder %s1489_s28, 9 }
  0x64   : > { %p428_p6 = pnand %p1100_p3, %p427_p4 }
  0x65   : > { %s433_s26 = sand.u32 (!%p428_p6), 1, %s1465_s22  }
  0x66   : > { %431 = sbr.rel (%p428_p6) target bundleno = 219 (0xdb), region = 36  ;;  %s1101_s16 = sshll.u32 (!%p428_p6), %s433_s26, 7 }
  0x67   : > { %s434_s15 = scalar_lea.sflag (!%p428_p6), [#allocation3], %s433_s26  ;;  %s1754_s8 = scalar_lea.vmem (!%p428_p6), [#allocation2], %s1101_s16 }
  0x6b   : > { %1428 = dma.done.wait (%p1624_p7), %s434_s15, 2048  }
  0x6c   : > { %1430 = vsyncadd (%p1624_p7), %s434_s15, 4294965248  ;;  %s443_s11 = sand.u32 1, %s1600_s29   ;;  %s1761_s14 = scalar_lea.vmem [#allocation5], %s1101_s16 }
  0x6d   : > { %s444_s10 = scalar_lea.sflag [#allocation6], %s443_s11 }
  0x6e   : > { %1432 = dma.done.wait (%p1624_p7), %s444_s10, 3072  }
  0x6f   : > { %1434 = vsyncadd (%p1624_p7), %s444_s10, 4294964224  ;;  %s1103_s0 = sshll.u32 %s433_s26, 6  ;;  %s464_s20 = scalar_lea.sflag [#allocation9], %s433_s26 }
  0x70   : > { %s1767_s21 = scalar_lea.vmem [#allocation7], %s1103_s0  ;;  %s1769_s27 = scalar_lea.vmem [#allocation8], %s1103_s0 }
  0x71   : > { %1436 = dma.done.wait (%p1624_p7), %s464_s20, 1024  }
  0x72   : > { %1438 = vsyncadd (%p1624_p7), %s464_s20, 4294966272  ;;  %s1776_s29 = sand.u32 1, %s1453_s19   ;;  %p1107_p5 = scmp.ne.s32.totalorder %s1473_s24, 0 }
  0x73   : > { %s1105_s13 = sshll.u32 %s1776_s29, 3 }
  0x74   : > { %s1779_s17 = scalar_lea.vmem [#allocation10], %s1105_s13  ;;  %s1781_s7 = scalar_lea.vmem [#allocation11], %s1105_s13 }
  0x75   : > { %530 = sbr.rel (%p1107_p5) target bundleno = 125 (0x7d), region = 56 }
  0x7a   : > { %v1515_v0 = vmov 0.0  }
  0x7b   : > { %531 = vst [vmem:[%s1779_s17] sm:$0xff] %v1515_v0 }
  0x7c   : > { %532 = vst [vmem:[%s1781_s7] sm:$0xff] %v1515_v0 }
  0x7d PF: > { %v533_v1 = vld [vmem:[%s1754_s8] sm:$0xff]  ;;  %v534_v2 = vld [vmem:[%s1754_s8 + $0x8] sm:$0xff]  ;;  %v535_v3 = vld [vmem:[%s1754_s8 + $0x10] sm:$0xff]  ;;  %s1110_s24 = sshll.u32 %s1477_s25, 3  ;;  %s859_s9 = sshll.u32 %s1779_s17, 4  ;;  %s860_s9 = int_to_ptr.vmem [resolvable:$true] %s859_s9 }
  0x7e   : > { %v536_v4 = vld [vmem:[%s1754_s8 + $0x18] sm:$0xff]  ;;  %v537_v5 = vld [vmem:[%s1754_s8 + $0x20] sm:$0xff]  ;;  %v538_v6 = vld [vmem:[%s1754_s8 + $0x28] sm:$0xff]  ;;  %v549_v10 = vmul.f32 0.05, %v533_v1  ;;  %s857_s6 = scalar_lea.hbm %s2072_s4, %s1110_s24  ;;  %s842_s16 = scalar_lea.sflag [#allocation4], %s1776_s29 }
  0x7f   : > { %v539_v7 = vld [vmem:[%s1754_s8 + $0x30] sm:$0xff]  ;;  %v540_v8 = vld [vmem:[%s1754_s8 + $0x38] sm:$0xff]  ;;  %v541_v9 = vld [vmem:[%s1754_s8 + $0x40] sm:$0xff]  ;;  %v550_v14 = vmul.f32 0.05, %v534_v2  ;;  %s861_s26 = sshll.u32 %s857_s6, 4  ;;  %s862_s26 = int_to_ptr.hbm [resolvable:$true] %s861_s26 }
  0x80   : > { %v542_v11 = vld [vmem:[%s1754_s8 + $0x48] sm:$0xff]  ;;  %v543_v12 = vld [vmem:[%s1754_s8 + $0x50] sm:$0xff]  ;;  %v544_v13 = vld [vmem:[%s1754_s8 + $0x58] sm:$0xff]  ;;  %v551_v18 = vmul.f32 0.05, %v535_v3  ;;  %s1341_s15 = sshra.s32 %s862_s26, 4  ;;  %s1342_s15 = int_to_ptr.hbm [resolvable:$true] %s1341_s15 }
  0x81   : > { %v545_v15 = vld [vmem:[%s1754_s8 + $0x60] sm:$0xff]  ;;  %v546_v16 = vld [vmem:[%s1754_s8 + $0x68] sm:$0xff]  ;;  %v547_v17 = vld [vmem:[%s1754_s8 + $0x70] sm:$0xff]  ;;  %v552_v20 = vmul.f32 0.05, %v536_v4  ;;  %p1348_p10 = scmp.lt.s32.totalorder %s1342_s15, %s2072_s4 }
  0x82   : > { %v548_v19 = vld [vmem:[%s1754_s8 + $0x78] sm:$0xff]  ;;  %v553_v21 = vmul.f32 0.05, %v537_v5  ;;  %v565_v22 = vld [vmem:[%s1761_s14] sm:$0xff]  ;;  %v554_v23 = vmul.f32 0.05, %v538_v6 }
  0x83   : > { %v555_v24 = vmul.f32 0.05, %v539_v7  ;;  %v556_v25 = vmul.f32 0.05, %v540_v8  ;;  %v557_v26 = vmul.f32 0.05, %v541_v9  ;;  %v581_v29 = vsub.f32 %v549_v10, %v565_v22 }
  0x84   : > { %v558_v27 = vmul.f32 0.05, %v542_v11  ;;  %v559_v28 = vmul.f32 0.05, %v543_v12  ;;  %v560_v30 = vmul.f32 0.05, %v544_v13 }
  0x85   : > { %v561_v31 = vmul.f32 0.05, %v545_v15  ;;  %v562_v32 = vmul.f32 0.05, %v546_v16  ;;  %v563_v33 = vmul.f32 0.05, %v547_v17  ;;  %v597_v50 = vmul.f32 %v581_v29, %v581_v29 }
  0x86   : > { %v566_v34 = vld [vmem:[%s1761_s14 + $0x8] sm:$0xff]  ;;  %v567_v35 = vld [vmem:[%s1761_s14 + $0x10] sm:$0xff]  ;;  %v568_v36 = vld [vmem:[%s1761_s14 + $0x18] sm:$0xff]  ;;  %v564_v37 = vmul.f32 0.05, %v548_v19  ;;  %s1343_s8 = scalar_lea.hbm %s1342_s15, 8 }
  0x87   : > { %v569_v38 = vld [vmem:[%s1761_s14 + $0x20] sm:$0xff]  ;;  %v570_v39 = vld [vmem:[%s1761_s14 + $0x28] sm:$0xff]  ;;  %v571_v40 = vld [vmem:[%s1761_s14 + $0x30] sm:$0xff]  ;;  %v582_v41 = vsub.f32 %v550_v14, %v566_v34  ;;  %v583_v42 = vsub.f32 %v551_v18, %v567_v35  ;;  %v584_v43 = vsub.f32 %v552_v20, %v568_v36  ;;  %p1344_p7 = scmp.ne.s32.totalorder %s1342_s15, %s1343_s8 }
  0x88   : > { %v572_v44 = vld [vmem:[%s1761_s14 + $0x38] sm:$0xff]  ;;  %v573_v45 = vld [vmem:[%s1761_s14 + $0x40] sm:$0xff]  ;;  %v574_v46 = vld [vmem:[%s1761_s14 + $0x48] sm:$0xff]  ;;  %v585_v47 = vsub.f32 %v553_v21, %v569_v38  ;;  %v586_v48 = vsub.f32 %v554_v23, %v570_v39  ;;  %v587_v49 = vsub.f32 %v555_v24, %v571_v40 }
  0x89   : > { %v575_v51 = vld [vmem:[%s1761_s14 + $0x50] sm:$0xff]  ;;  %v576_v52 = vld [vmem:[%s1761_s14 + $0x58] sm:$0xff]  ;;  %v577_v53 = vld [vmem:[%s1761_s14 + $0x60] sm:$0xff]  ;;  %v588_v54 = vsub.f32 %v556_v25, %v572_v44  ;;  %v589_v55 = vsub.f32 %v557_v26, %v573_v45  ;;  %v590_v56 = vsub.f32 %v558_v27, %v574_v46  ;;  %v598_v57 = vmul.f32 %v582_v41, %v582_v41  ;;  %p1345_p8 = pnand %p1344_p7, %p1643_p12 }
  0x8a   : > { %v578_v58 = vld [vmem:[%s1761_s14 + $0x68] sm:$0xff]  ;;  %v579_v59 = vld [vmem:[%s1761_s14 + $0x70] sm:$0xff]  ;;  %v580_v60 = vld [vmem:[%s1761_s14 + $0x78] sm:$0xff]  ;;  %v591_v61 = vsub.f32 %v559_v28, %v575_v51  ;;  %v592_v62 = vsub.f32 %v560_v30, %v576_v52  ;;  %v593_v63 = vsub.f32 %v561_v31, %v577_v53  ;;  %v599_v0 = vmul.f32 %v583_v42, %v583_v42  ;;  %s1347_s14 = scalar_lea.hbm %s2072_s4, 16 }
  0x8b   : > { %v594_v1 = vsub.f32 %v562_v32, %v578_v58  ;;  %v595_v2 = vsub.f32 %v563_v33, %v579_v59  ;;  %v596_v3 = vsub.f32 %v564_v37, %v580_v60  ;;  %v600_v4 = vmul.f32 %v584_v43, %v584_v43  ;;  %p1346_p9 = pneg %p1345_p8  ;;  %p1349_p11 = scmp.lt.s32.totalorder %s1347_s14, %s1343_s8 }
  0x8c   : > { %v601_v5 = vmul.f32 %v585_v47, %v585_v47  ;;  %v602_v6 = vmul.f32 %v586_v48, %v586_v48  ;;  %v603_v7 = vmul.f32 %v587_v49, %v587_v49  ;;  %v604_v8 = vmul.f32 %v588_v54, %v588_v54 }
  0x8d   : > { %v605_v9 = vmul.f32 %v589_v55, %v589_v55  ;;  %v607_v10 = vmul.f32 %v591_v61, %v591_v61  ;;  %v606_v11 = vmul.f32 %v590_v56, %v590_v56  ;;  %v608_v12 = vmul.f32 %v592_v62, %v592_v62  ;;  %p1350_p13 = por %p1349_p11, %p1348_p10 }
  0x8e   : > { %v609_v13 = vmul.f32 %v593_v63, %v593_v63  ;;  %v611_v14 = vmul.f32 %v595_v2, %v595_v2  ;;  %v1818_v15 = vadd.f32 %v599_v0, %v597_v50  ;;  %v1820_v16 = vadd.f32 %v600_v4, %v598_v57 }
  0x8f   : > { %v1822_v17 = vadd.f32 %v603_v7, %v601_v5  ;;  %v610_v18 = vmul.f32 %v594_v1, %v594_v1  ;;  %v612_v19 = vmul.f32 %v596_v3, %v596_v3  ;;  %v1824_v20 = vadd.f32 %v604_v8, %v602_v6  ;;  %p1351_p0 = pnand %p1350_p13, %p1346_p9 }
  0x90   : > { %v1826_v21 = vadd.f32 %v607_v10, %v605_v9  ;;  %1279 = vrsqrt.f32 %v1818_v15  ;;  %v1829_v22 = vadd.f32 %v608_v12, %v606_v11  ;;  %v1832_v23 = vadd.f32 %v611_v14, %v609_v13 }
  0x91   : > { %1281 = vrsqrt.f32 %v1820_v16  ;;  %v1835_v24 = vadd.f32 %v612_v19, %v610_v18  ;;  %vm628_vm0 = vcmp.eq.f32.partialorder %v1818_v15, inf  ;;  %v631_v29 = vand.u32 2147483648, %v1818_v15 }
  0x92   : > { %1283 = vrsqrt.f32 %v1822_v17  ;;  %vm630_vm1 = vcmp.eq.f32.partialorder %v1818_v15, 0.0  ;;  %vm640_vm2 = vcmp.eq.f32.partialorder %v1820_v16, inf  ;;  %v643_v33 = vand.u32 2147483648, %v1820_v16 }
  0x93   : > { %1285 = vrsqrt.f32 %v1824_v20  ;;  %v655_v35 = vand.u32 2147483648, %v1822_v17  ;;  %vm642_vm3 = vcmp.eq.f32.partialorder %v1820_v16, 0.0  ;;  %vm652_vm4 = vcmp.eq.f32.partialorder %v1822_v17, inf }
  0x94   : > { %1287 = vrsqrt.f32 %v1826_v21  ;;  %v667_v39 = vand.u32 2147483648, %v1824_v20  ;;  %v679_v40 = vand.u32 2147483648, %v1826_v21  ;;  %vm654_vm5 = vcmp.eq.f32.partialorder %v1822_v17, 0.0 }
  0x95   : > { %1289 = vrsqrt.f32 %v1829_v22  ;;  %vm664_vm6 = vcmp.eq.f32.partialorder %v1824_v20, inf  ;;  %v691_v45 = vand.u32 2147483648, %v1829_v22  ;;  %vm676_vm7 = vcmp.eq.f32.partialorder %v1826_v21, inf }
  0x96   : > { %v1280_v25 = vpop.eup %1279  ;;  %1291 = vrsqrt.f32 %v1832_v23  ;;  %v703_v50 = vand.u32 2147483648, %v1832_v23  ;;  %vm666_vm8 = vcmp.eq.f32.partialorder %v1824_v20, 0.0  ;;  %vm678_vm9 = vcmp.eq.f32.partialorder %v1826_v21, 0.0 }
  0x97   : > { %v1282_v26 = vpop.eup %1281  ;;  %v622_v27 = vmul.f32 %v1280_v25, %v1818_v15  ;;  %1293 = vrsqrt.f32 %v1835_v24  ;;  %vm688_vm10 = vcmp.eq.f32.partialorder %v1829_v22, inf  ;;  %vm700_vm11 = vcmp.eq.f32.partialorder %v1832_v23, inf }
  0x98   : > { %v1284_v28 = vpop.eup %1283  ;;  %v634_v30 = vmul.f32 %v1282_v26, %v1820_v16  ;;  %vm690_vm12 = vcmp.eq.f32.partialorder %v1829_v22, 0.0  ;;  %vm712_vm13 = vcmp.eq.f32.partialorder %v1835_v24, inf  ;;  %vm702_vm14 = vcmp.eq.f32.partialorder %v1832_v23, 0.0 }
  0x99   : > { %v1286_v31 = vpop.eup %1285  ;;  %v623_v32 = vmul.f32 %v1280_v25, %v622_v27  ;;  %v646_v34 = vmul.f32 %v1284_v28, %v1822_v17  ;;  %vm714_vm15 = vcmp.eq.f32.partialorder %v1835_v24, 0.0 }
  0x9a   : > { %v1288_v36 = vpop.eup %1287  ;;  %v635_v37 = vmul.f32 %v1282_v26, %v634_v30  ;;  %v658_v38 = vmul.f32 %v1286_v31, %v1824_v20 }
  0x9b   : > { %v1290_v41 = vpop.eup %1289  ;;  %v624_v42 = vmul.f32 0.5, %v623_v32  ;;  %v647_v43 = vmul.f32 %v1284_v28, %v646_v34  ;;  %v670_v44 = vmul.f32 %v1288_v36, %v1826_v21 }
  0x9c   : > { %v1292_v46 = vpop.eup %1291  ;;  %v636_v47 = vmul.f32 0.5, %v635_v37  ;;  %v659_v48 = vmul.f32 %v1286_v31, %v658_v38  ;;  %v682_v49 = vmul.f32 %v1290_v41, %v1829_v22 }
  0x9d   : > { %v1294_v51 = vpop.eup %1293  ;;  %v625_v52 = vsub.f32 1.5, %v624_v42  ;;  %v648_v53 = vmul.f32 0.5, %v647_v43  ;;  %v671_v54 = vmul.f32 %v1288_v36, %v670_v44  ;;  %v694_v55 = vmul.f32 %v1292_v46, %v1832_v23 }
  0x9e   : > { %v637_v56 = vsub.f32 1.5, %v636_v47  ;;  %v660_v57 = vmul.f32 0.5, %v659_v48  ;;  %v683_v58 = vmul.f32 %v1290_v41, %v682_v49  ;;  %v706_v59 = vmul.f32 %v1294_v51, %v1835_v24  ;;  %v1928_v47 = vld [vmem:[%s1769_s27 + $0x28] sm:$0xff]  ;;  %v1931_v48 = vld [vmem:[%s1769_s27 + $0x30] sm:$0xff] }
  0x9f   : > { %v626_v60 = vmul.f32 %v1280_v25, %v625_v52  ;;  %v649_v61 = vsub.f32 1.5, %v648_v53  ;;  %v672_v62 = vmul.f32 0.5, %v671_v54  ;;  %v695_v63 = vmul.f32 %v1292_v46, %v694_v55 }
  0xa0   : > { %v638_v0 = vmul.f32 %v1282_v26, %v637_v56  ;;  %v661_v1 = vsub.f32 1.5, %v660_v57  ;;  %v684_v2 = vmul.f32 0.5, %v683_v58  ;;  %v707_v3 = vmul.f32 %v1294_v51, %v706_v59 }
  0xa1   : > { %v627_v4 = vmul.f32 %v626_v60, %v1818_v15  ;;  %v650_v5 = vmul.f32 %v1284_v28, %v649_v61  ;;  %v673_v6 = vsub.f32 1.5, %v672_v62  ;;  %v696_v7 = vmul.f32 0.5, %v695_v63 }
  0xa2   : > { %v639_v8 = vmul.f32 %v638_v0, %v1820_v16  ;;  %v662_v9 = vmul.f32 %v1286_v31, %v661_v1  ;;  %v685_v10 = vsub.f32 1.5, %v684_v2  ;;  %v708_v11 = vmul.f32 0.5, %v707_v3  ;;  %v1895_v31 = vld [vmem:[%s1769_s27] sm:$0xff] }
  0xa3   : > { %v629_v12 = vsel %vm628_vm0, %v1818_v15, %v627_v4  ;;  %v651_v13 = vmul.f32 %v650_v5, %v1822_v17  ;;  %v674_v14 = vmul.f32 %v1288_v36, %v673_v6  ;;  %v697_v18 = vsub.f32 1.5, %v696_v7  ;;  %v1906_v36 = vld [vmem:[%s1769_s27 + $0x8] sm:$0xff] }
  0xa4   : > { %v632_v19 = vsel %vm630_vm1, %v631_v29, %v629_v12  ;;  %v641_v25 = vsel %vm640_vm2, %v1820_v16, %v639_v8  ;;  %v663_v26 = vmul.f32 %v662_v9, %v1824_v20  ;;  %v686_v27 = vmul.f32 %v1290_v41, %v685_v10  ;;  %v1917_v41 = vld [vmem:[%s1769_s27 + $0x18] sm:$0xff] }
  0xa5   : > { %v644_v28 = vsel %vm642_vm3, %v643_v33, %v641_v25  ;;  %v653_v30 = vsel %vm652_vm4, %v1822_v17, %v651_v13  ;;  %v675_v15 = vmul.f32 %v674_v14, %v1826_v21  ;;  %v698_v29 = vmul.f32 %v1292_v46, %v697_v18  ;;  %v1925_v46 = vld [vmem:[%s1769_s27 + $0x20] sm:$0xff] }
  0xa6   : > { %v656_v32 = vsel %vm654_vm5, %v655_v35, %v653_v30  ;;  %v665_v16 = vsel %vm664_vm6, %v1824_v20, %v663_v26  ;;  %v687_v33 = vmul.f32 %v686_v27, %v1829_v22  ;;  %v709_v34 = vsub.f32 1.5, %v708_v11  ;;  %v1914_v35 = vld [vmem:[%s1769_s27 + $0x10] sm:$0xff]  ;;  %v717_v13 = vld [vmem:[%s1779_s17] sm:$0xff] }
  0xa7   : > { %v677_v37 = vsel %vm676_vm7, %v1826_v21, %v675_v15  ;;  %v699_v38 = vmul.f32 %v698_v29, %v1832_v23  ;;  %v718_v17 = vadd.f32 %v644_v28, %v632_v19  ;;  %v668_v42 = vsel %vm666_vm8, %v667_v39, %v665_v16 }
  0xa8   : > { %v710_v43 = vmul.f32 %v1294_v51, %v709_v34  ;;  %v715_v44 = vand.u32 2147483648, %v1835_v24  ;;  %v751_v49 = vand.u32 2147483647, %v1895_v31  ;;  %v680_v52 = vsel %vm678_vm9, %v679_v40, %v677_v37  ;;  %v1942_v51 = vld [vmem:[%s1769_s27 + $0x38] sm:$0xff] }
  0xa9   : > { %v689_v20 = vsel %vm688_vm10, %v1829_v22, %v687_v33  ;;  %v719_v39 = vadd.f32 %v718_v17, %v656_v32  ;;  %v752_v53 = vand.u32 2147483647, %v1906_v36  ;;  %v701_v54 = vsel %vm700_vm11, %v1832_v23, %v699_v38 }
  0xaa   : > { %v711_v55 = vmul.f32 %v710_v43, %v1835_v24  ;;  %v753_v56 = vand.u32 2147483647, %v1914_v35  ;;  %v754_v21 = vand.u32 2147483647, %v1917_v41  ;;  %v755_v57 = vand.u32 2147483647, %v1925_v46 }
  0xab   : > { %v720_v40 = vadd.f32 %v719_v39, %v668_v42  ;;  %v756_v58 = vand.u32 2147483647, %v1928_v47  ;;  %v757_v59 = vand.u32 2147483647, %v1931_v48  ;;  %v692_v60 = vsel %vm690_vm12, %v691_v45, %v689_v20 }
  0xac   : > { %v758_v61 = vand.u32 2147483647, %v1942_v51  ;;  %v759_v62 = vsub.f32 0.0, %v751_v49  ;;  %v760_v63 = vsub.f32 0.0, %v752_v53  ;;  %v713_v0 = vsel %vm712_vm13, %v1835_v24, %v711_v55 }
  0xad   : > { %v721_v1 = vadd.f32 %v720_v40, %v680_v52  ;;  %v761_v2 = vsub.f32 0.0, %v753_v56  ;;  %v762_v3 = vsub.f32 0.0, %v754_v21  ;;  %v704_v22 = vsel %vm702_vm14, %v703_v50, %v701_v54 }
  0xae   : > { %v763_v45 = vsub.f32 0.0, %v755_v57  ;;  %v764_v4 = vsub.f32 0.0, %v756_v58  ;;  %v765_v5 = vsub.f32 0.0, %v757_v59  ;;  %v767_v7 = vmul.f32 1.442695, %v759_v62 }
  0xaf   : > { %v722_v6 = vadd.f32 %v721_v1, %v692_v60  ;;  %v769_v8 = vmul.f32 1.442695, %v760_v63  ;;  %v771_v9 = vmul.f32 1.442695, %v761_v2  ;;  %v716_v10 = vsel %vm714_vm15, %v715_v44, %v713_v0 }
  0xb0   : > { %v766_v11 = vsub.f32 0.0, %v758_v61  ;;  %v773_v23 = vmul.f32 1.442695, %v762_v3  ;;  %1295 = vpow2.f32 %v767_v7  ;;  %v775_v50 = vmul.f32 1.442695, %v763_v45 }
  0xb1   : > { %v723_v12 = vadd.f32 %v722_v6, %v704_v22  ;;  %1297 = vpow2.f32 %v769_v8  ;;  %v777_v14 = vmul.f32 1.442695, %v764_v4  ;;  %v779_v19 = vmul.f32 1.442695, %v765_v5 }
  0xb2   : > { %1299 = vpow2.f32 %v771_v9  ;;  %v781_v25 = vmul.f32 1.442695, %v766_v11 }
  0xb3   : > { %v724_v18 = vadd.f32 %v723_v12, %v716_v10  ;;  %1301 = vpow2.f32 %v773_v23 }
  0xb4   : > { %1303 = vpow2.f32 %v775_v50 }
  0xb5   : > { %v725_v26 = vadd.f32 %v724_v18, %v717_v13  ;;  %1305 = vpow2.f32 %v777_v14 }
  0xb6   : > { %v1296_v24 = vpop.eup %1295  ;;  %1307 = vpow2.f32 %v779_v19 }
  0xb7   : > { %726 = vst [vmem:[%s1779_s17] sm:$0xff] %v725_v26  ;;  %v1298_v27 = vpop.eup %1297  ;;  %1309 = vpow2.f32 %v781_v25  ;;  %v783_v28 = vadd.f32 1.0, %v1296_v24 }
  0xb8   : > { %1354 = shalt.err (!%p1351_p0)
}
  0xb9   : > { %1154 = dma.vmem_to_hbm [thread:$0]  (%p1643_p12), %s860_s9, 128, %s862_s26, %s842_s16   ;;  %v1300_v30 = vpop.eup %1299  ;;  %v784_v15 = vadd.f32 1.0, %v1298_v27  ;;  %1311 = vlog2.f32 %v783_v28  ;;  %v727_v43 = vld [vmem:[%s1767_s21] sm:$0xff]  ;;  %v728_v49 = vld [vmem:[%s1767_s21 + $0x8] sm:$0xff]  ;;  %v743_v52 = vmax.f32 %v1895_v31, 0.0  ;;  %v729_v53 = vld [vmem:[%s1767_s21 + $0x10] sm:$0xff] }
  0xba   : > { %v1302_v29 = vpop.eup %1301  ;;  %v785_v32 = vadd.f32 1.0, %v1300_v30  ;;  %v744_v54 = vmax.f32 %v1906_v36, 0.0  ;;  %v730_v56 = vld [vmem:[%s1767_s21 + $0x18] sm:$0xff]  ;;  %v745_v21 = vmax.f32 %v1914_v35, 0.0  ;;  %v816_v57 = vmul.f32 %v1895_v31, %v727_v43  ;;  %v731_v0 = vld [vmem:[%s1767_s21 + $0x20] sm:$0xff]  ;;  %v732_v4 = vld [vmem:[%s1767_s21 + $0x28] sm:$0xff] }
  0xbb   : > { %v1304_v16 = vpop.eup %1303  ;;  %v786_v33 = vadd.f32 1.0, %v1302_v29  ;;  %1313 = vlog2.f32 %v784_v15  ;;  %v746_v59 = vmax.f32 %v1917_v41, 0.0  ;;  %v747_v60 = vmax.f32 %v1925_v46, 0.0  ;;  %v733_v18 = vld [vmem:[%s1767_s21 + $0x30] sm:$0xff]  ;;  %v734_v15 = vld [vmem:[%s1767_s21 + $0x38] sm:$0xff]  ;;  %s2097_s13 = sld [smem:[#allocation39_spill]] }
  0xbc   : > { %v1306_v34 = vpop.eup %1305  ;;  %v787_v37 = vadd.f32 1.0, %v1304_v16  ;;  %1315 = vlog2.f32 %v785_v32  ;;  %v817_v62 = vmul.f32 %v1906_v36, %v728_v49  ;;  %v748_v1 = vmax.f32 %v1928_v47, 0.0  ;;  %s873_s12 = sshll.u32 %s1781_s7, 4  ;;  %s847_s6 = scalar_lea.sflag [#allocation12], %s1776_s29  ;;  %s874_s12 = int_to_ptr.vmem [resolvable:$true] %s873_s12 }
  0xbd   : > { %v1308_v38 = vpop.eup %1307  ;;  %v788_v17 = vadd.f32 1.0, %v1306_v34  ;;  %1317 = vlog2.f32 %v786_v33  ;;  %v818_v22 = vmul.f32 %v1914_v35, %v729_v53  ;;  %v749_v31 = vmax.f32 %v1931_v48, 0.0 }
  0xbe   : > { %v1310_v42 = vpop.eup %1309  ;;  %v789_v44 = vadd.f32 1.0, %v1308_v38  ;;  %1319 = vlog2.f32 %v787_v37  ;;  %v819_v7 = vmul.f32 %v1917_v41, %v730_v56  ;;  %v750_v36 = vmax.f32 %v1942_v51, 0.0 }
  0xbf   : > { %v790_v20 = vadd.f32 1.0, %v1310_v42  ;;  %1321 = vlog2.f32 %v788_v17  ;;  %v1312_v39 = vpop.eup %1311  ;;  %v820_v35 = vmul.f32 %v1925_v46, %v731_v0  ;;  %v821_v26 = vmul.f32 %v1928_v47, %v732_v4 }
  0xc0   : > { %1323 = vlog2.f32 %v789_v44  ;;  %v792_v40 = vmul.f32 0.6931472, %v1312_v39  ;;  %v822_v32 = vmul.f32 %v1931_v48, %v733_v18  ;;  %v823_v34 = vmul.f32 %v1942_v51, %v734_v15  ;;  %v815_v44 = vld [vmem:[%s1781_s7] sm:$0xff] }
  0xc1   : > { %v1314_v55 = vpop.eup %1313  ;;  %1325 = vlog2.f32 %v790_v20  ;;  %s871_s17 = scalar_lea.hbm %s2097_s13, %s1110_s24  ;;  %s1375_s24 = scalar_lea.hbm %s2097_s13, 16 }
  0xc2   : > { %v1316_v58 = vpop.eup %1315  ;;  %v794_v61 = vmul.f32 0.6931472, %v1314_v55  ;;  %v807_v3 = vadd.f32 %v792_v40, %v743_v52  ;;  %s875_s23 = sshll.u32 %s871_s17, 4  ;;  %s876_s23 = int_to_ptr.hbm [resolvable:$true] %s875_s23 }
  0xc3   : > { %v1318_v63 = vpop.eup %1317  ;;  %v796_v2 = vmul.f32 0.6931472, %v1316_v58  ;;  %s1369_s9 = sshra.s32 %s876_s23, 4  ;;  %s1370_s9 = int_to_ptr.hbm [resolvable:$true] %s1369_s9 }
  0xc4   : > { %v1320_v45 = vpop.eup %1319  ;;  %v798_v5 = vmul.f32 0.6931472, %v1318_v63  ;;  %v808_v6 = vadd.f32 %v794_v61, %v744_v54  ;;  %v824_v11 = vsub.f32 %v807_v3, %v816_v57  ;;  %s1371_s26 = scalar_lea.hbm %s1370_s9, 8  ;;  %p1376_p6 = scmp.lt.s32.totalorder %s1370_s9, %s2097_s13 }
  0xc5   : > { %v1322_v8 = vpop.eup %1321  ;;  %v800_v9 = vmul.f32 0.6931472, %v1320_v45  ;;  %v809_v10 = vadd.f32 %v796_v2, %v745_v21  ;;  %p1372_p2 = scmp.ne.s32.totalorder %s1370_s9, %s1371_s26  ;;  %p1377_p5 = scmp.lt.s32.totalorder %s1375_s24, %s1371_s26 }
  0xc6   : > { %v1324_v23 = vpop.eup %1323  ;;  %v802_v12 = vmul.f32 0.6931472, %v1322_v8  ;;  %v810_v50 = vadd.f32 %v798_v5, %v746_v59  ;;  %v825_v13 = vsub.f32 %v808_v6, %v817_v62 }
  0xc7   : > { %v1326_v14 = vpop.eup %1325  ;;  %v804_v19 = vmul.f32 0.6931472, %v1324_v23  ;;  %v811_v25 = vadd.f32 %v800_v9, %v747_v60  ;;  %v826_v41 = vsub.f32 %v809_v10, %v818_v22  ;;  %p1373_p3 = pnand %p1372_p2, %p1643_p12  ;;  %p1378_p7 = por %p1377_p5, %p1376_p6 }
  0xc8   : > { %v806_v24 = vmul.f32 0.6931472, %v1326_v14  ;;  %v812_v27 = vadd.f32 %v802_v12, %v748_v1  ;;  %v827_v28 = vsub.f32 %v810_v50, %v819_v7  ;;  %v832_v30 = vadd.f32 %v825_v13, %v824_v11 }
  0xc9   : > { %v813_v29 = vadd.f32 %v804_v19, %v749_v31  ;;  %v828_v46 = vsub.f32 %v811_v25, %v820_v35  ;;  %p1374_p4 = pneg %p1373_p3 }
  0xca   : > { %v833_v16 = vadd.f32 %v832_v30, %v826_v41  ;;  %v814_v33 = vadd.f32 %v806_v24, %v750_v36  ;;  %v829_v37 = vsub.f32 %v812_v27, %v821_v26 }
  0xcb   : > { %v830_v38 = vsub.f32 %v813_v29, %v822_v32  ;;  %p1379_p8 = pnand %p1378_p7, %p1374_p4 }
  0xcc   : > { %v834_v47 = vadd.f32 %v833_v16, %v827_v28  ;;  %v831_v42 = vsub.f32 %v814_v33, %v823_v34 }
  0xce   : > { %v835_v17 = vadd.f32 %v834_v47, %v828_v46 }
  0xd0   : > { %v836_v43 = vadd.f32 %v835_v17, %v829_v37 }
  0xd2   : > { %v837_v48 = vadd.f32 %v836_v43, %v830_v38 }
  0xd4   : > { %v838_v49 = vadd.f32 %v837_v48, %v831_v42 }
  0xd6   : > { %v839_v51 = vadd.f32 %v838_v49, %v815_v44 }
  0xd8   : > { %840 = vst [vmem:[%s1781_s7] sm:$0xff] %v839_v51 }
  0xd9   : > { %1382 = shalt.err (!%p1379_p8)
}
  0xda   : > { %1155 = dma.vmem_to_hbm [thread:$0]  (%p1643_p12), %s874_s12, 128, %s876_s23, %s847_s6  }
  0xdb PF: > { %p1165_p9 = scmp.ge.s32.totalorder %s1489_s28, 2  ;;  %s887_s29 = sand.u32 1, %s1449_s18  }
  0xdc   : > { %s888_s7 = scalar_lea.sflag [#allocation4], %s887_s29 }
  0xdd   : > { %p1159_p10 = pnand %p1165_p9, %p1651_p1 }
  0xdf   : > { %p1160_p11 = pneg %p1159_p10 }
  0xe1   : > { %1440 = dma.done.wait (%p1160_p11), %s888_s7, 128  }
  0xe2   : > { %1442 = vsyncadd (%p1160_p11), %s888_s7, 4294967168  ;;  %s898_s11 = scalar_lea.sflag [#allocation12], %s887_s29 }
  0xe3   : > { %1444 = dma.done.wait (%p1160_p11), %s898_s11, 128  }
  0xe4   : > { %1446 = vsyncadd (%p1160_p11), %s898_s11, 4294967168  ;;  %s31_s28 = sadd.s32 1, %s1489_s28   ;;  %s2098_s30 = sld [smem:[#allocation30_spill]] }
  0xe5   : > { %p28_p13 = scmp.ge.s32.totalorder %s31_s28, 10   ;;  %s2099_s20 = sld [smem:[#allocation36_spill]] }
  0xe6   : > { %s2100_s10 = sld [smem:[#allocation31_spill]]  ;;  %s2106_s18 = smov %s1453_s19 }
  0xe7   : > { %s2101_s23 = sld [smem:[#allocation37_spill]]  ;;  %s2108_s21 = smov %s1465_s22 }
  0xe8   : > { %s2102_s24 = sld [smem:[#allocation32_spill]]  ;;  %30 = sbr.rel (!%p28_p13) target bundleno = 18 (0x12), region = 159 }
  0xe9   : > { %s2103_s25 = sld [smem:[#allocation33_spill]] }
  0xea   : > { %s2104_s26 = sld [smem:[#allocation34_spill]]  ;;  %s2107_s19 = smov %s2098_s30 }
  0xeb   : > { %s2105_s27 = sld [smem:[#allocation35_spill]] }
  0xec   : > { %s2109_s22 = smov %s2100_s10 }
  0xed   :  { %904 = vsyncpa [#allocation3], 1 }
  0xee   :  { %906 = vsyncpa [#allocation3 + $0x1], 1 }
  0xef   :  { %907 = vsyncpa [#allocation6], 1 }
  0xf0   :  { %909 = vsyncpa [#allocation6 + $0x1], 1 }
  0xf1   :  { %910 = vsyncpa [#allocation9], 1 }
  0xf2   :  { %912 = vsyncpa [#allocation9 + $0x1], 1 }
  0xf3   :  { %913 = vsyncpa [#allocation4], 1 }
  0xf4   :  { %915 = vsyncpa [#allocation4 + $0x1], 1 }
  0xf5   :  { %916 = vsyncpa [#allocation12], 1 }
  0xf6   :  { %918 = vsyncpa [#allocation12 + $0x1], 1 }

</bundles_post_ra>
